<compile_context>
chip_gen: v6e
topology: v6e:2x2x1
jax: 0.10.0
libtpu: 0.0.40
codegen_flags: <defaults>
</compile_context>

<pallas_src>
import functools

import jax
import jax.numpy as jnp
from jax.experimental import pallas as pl
from jax.experimental.pallas import tpu as pltpu


def _round_up(n, m):
    return ((n + m - 1) // m) * m


def policy_net_kernel(x_ref, w1_ref, b1_ref, w2_ref, b2_ref, out_ref, *,
                      matmul_dtype):
    """One (TB, S) batch tile: linear1 + relu + linear2 + softmax."""
    x = x_ref[...]
    if x.dtype != matmul_dtype:
        x = x.astype(matmul_dtype)                       # feed the MXU bf16

    # linear1 + relu (bias / relu in f32, MXU accumulates in f32)
    h = jnp.dot(x, w1_ref[...], preferred_element_type=jnp.float32)   # (TB, 32)
    h = jnp.maximum(h + b1_ref[...], 0.0)

    # linear2
    logits = jnp.dot(h.astype(matmul_dtype), w2_ref[...],
                     preferred_element_type=jnp.float32)              # (TB, A)
    logits = logits + b2_ref[...]

    num_actions = logits.shape[-1]
    if num_actions == 2:
        # Closed-form 2-class softmax: static 1-wide slices, elementwise max,
        # exp (EUP) and approx reciprocal (EUP) -> no XLU cross-lane reductions.
        l0 = logits[:, 0:1]
        l1 = logits[:, 1:2]
        m = jnp.maximum(l0, l1)
        e0 = jnp.exp(l0 - m)
        e1 = jnp.exp(l1 - m)
        inv = pl.reciprocal(e0 + e1, approx=True)
        probs = jnp.concatenate([e0 * inv, e1 * inv], axis=-1)
    else:
        # Generic numerically-stable softmax over the last (action) axis.
        m = jnp.max(logits, axis=-1, keepdims=True)
        e = jnp.exp(logits - m)
        probs = e * pl.reciprocal(jnp.sum(e, axis=-1, keepdims=True), approx=True)

    # NOTE: output last dim (A) is lane-sparse (A << 128).  If a profile at
    # large batch shows the store/writeback path as the limiter, pad A to a
    # lane-dense width here and slice in the wrapper, or fuse the downstream
    # argmax/sampling into the kernel.
    out_ref[...] = probs.astype(out_ref.dtype)


def policy_net_forward(x, w1, b1, w2, b2, *, block_batch=1024,
                       matmul_dtype=jnp.bfloat16):
    """x: (B, state_size) f32 -> (B, action_space) f32 softmax probabilities.

    Weights are stored already-transposed as (in, out); biases as (1, out).
    """
    B, S = x.shape
    H = w1.shape[1]
    A = w2.shape[1]

    # Batch tile: multiple of 8 sublanes, capped by block_batch; pad B up.
    TB = max(8, min(_round_up(block_batch, 8), _round_up(B, 8)))
    Bp = _round_up(B, TB)
    if Bp != B:
        x = jnp.pad(x, ((0, Bp - B), (0, 0)))

    # Matmul operands in bf16 (halves their bytes, MXU-native); biases stay f32.
    w1c = w1.astype(matmul_dtype)
    w2c = w2.astype(matmul_dtype)

    out = pl.pallas_call(
        functools.partial(policy_net_kernel, matmul_dtype=matmul_dtype),
        out_shape=jax.ShapeDtypeStruct((Bp, A), jnp.float32),
        grid=(Bp // TB,),
        in_specs=[
            pl.BlockSpec((TB, S), lambda i: (i, 0)),   # batch-tiled activations
            pl.BlockSpec((S, H), lambda i: (0, 0)),    # weights: constant block ->
            pl.BlockSpec((1, H), lambda i: (0, 0)),    #   stay VMEM-resident
            pl.BlockSpec((H, A), lambda i: (0, 0)),
            pl.BlockSpec((1, A), lambda i: (0, 0)),
        ],
        out_specs=pl.BlockSpec((TB, A), lambda i: (i, 0)),
        compiler_params=pltpu.CompilerParams(
            dimension_semantics=("parallel",)),        # shard tiles across TCs
    )(x, w1c, b1, w2c, b2)

    return out[:B] if Bp != B else out


def init_params(key, state_size, hidden, action_space):
    """Deterministic synthetic init (PyTorch-Linear-style uniform bounds)."""
    k1, k2, k3, k4 = jax.random.split(key, 4)
    bound1 = 1.0 / jnp.sqrt(jnp.float32(state_size))
    bound2 = 1.0 / jnp.sqrt(jnp.float32(hidden))
    # Stored as (in, out): transpose of PyTorch's (out, in) weight layout.
    w1 = jax.random.uniform(k1, (state_size, hidden), jnp.float32, -bound1, bound1)
    b1 = jax.random.uniform(k2, (1, hidden), jnp.float32, -bound1, bound1)
    w2 = jax.random.uniform(k3, (hidden, action_space), jnp.float32, -bound2, bound2)
    b2 = jax.random.uniform(k4, (1, action_space), jnp.float32, -bound2, bound2)
    return w1, b1, w2, b2


# TODO(synk): Categorical sampling (act_sample) and the Adam policy-gradient
# update() are host/training-side and are not part of this forward kernel.

if __name__ == "__main__":
    # CartPole-ish shapes: state_size=4, hidden=32 (fixed by module), actions=2.
    batch, state_size, hidden, action_space = 8, 4, 32, 2

    key = jax.random.PRNGKey(0)
    kx, kp = jax.random.split(key)
    x = jax.random.normal(kx, (batch, state_size), jnp.float32)
    w1, b1, w2, b2 = init_params(kp, state_size, hidden, action_space)

    # Pure-JAX f32 reference (same math as the PyTorch forward).
    ref = jax.nn.softmax(jnp.maximum(x @ w1 + b1, 0.0) @ w2 + b2, axis=1)

    # 1) full-precision matmul path.
    probs_f32 = jax.block_until_ready(
        policy_net_forward(x, w1, b1, w2, b2, matmul_dtype=jnp.float32))
    assert probs_f32.shape == (batch, action_space)
    assert jnp.allclose(probs_f32, ref, atol=5e-3)
    assert jnp.allclose(jnp.sum(probs_f32, axis=1), 1.0, atol=5e-3)

    # 2) default bf16-to-MXU path (looser tolerance for bf16 operands).
    probs_bf16 = jax.block_until_ready(policy_net_forward(x, w1, b1, w2, b2))
    assert probs_bf16.shape == (batch, action_space)
    assert jnp.allclose(probs_bf16, ref, atol=2e-2)
    assert jnp.allclose(jnp.sum(probs_bf16, axis=1), 1.0, atol=5e-3)

    # 3) multi-tile grid + batch padding path (300 rows -> 3 tiles of 128).
    xb = jax.random.normal(kx, (300, state_size), jnp.float32)
    refb = jax.nn.softmax(jnp.maximum(xb @ w1 + b1, 0.0) @ w2 + b2, axis=1)
    probsb = jax.block_until_ready(
        policy_net_forward(xb, w1, b1, w2, b2, block_batch=128))
    assert probsb.shape == (300, action_space)
    assert jnp.allclose(probsb, refb, atol=2e-2)

    print("KERNEL_OK")
</pallas_src>

<mosaic_0001>
module attributes {stable_mosaic.version = 11 : i64} {
  func.func @policy_net_kernel(%arg0: i32, %arg1: memref<8x4xf32, #tpu.memory_space<vmem>>, %arg2: memref<4x32xf32, #tpu.memory_space<vmem>>, %arg3: memref<1x32xf32, #tpu.memory_space<vmem>>, %arg4: memref<32x2xf32, #tpu.memory_space<vmem>>, %arg5: memref<1x2xf32, #tpu.memory_space<vmem>>, %arg6: memref<8x2xf32, #tpu.memory_space<vmem>>) attributes {dimension_semantics = [#tpu.dimension_semantics<parallel>], iteration_bounds = array<i64: 1>, scalar_prefetch = 0 : i64, scratch_operands = 0 : i64, tpu.core_type = #tpu.core_type<tc>, window_params = [{transform_indices = @transform_0, window_bounds = array<i64: 8, 4>}, {pipeline_mode = #tpu.pipeline_mode<synchronous>, transform_indices = @transform_1, window_bounds = array<i64: 4, 32>}, {pipeline_mode = #tpu.pipeline_mode<synchronous>, transform_indices = @transform_2, window_bounds = array<i64: 1, 32>}, {pipeline_mode = #tpu.pipeline_mode<synchronous>, transform_indices = @transform_3, window_bounds = array<i64: 32, 2>}, {pipeline_mode = #tpu.pipeline_mode<synchronous>, transform_indices = @transform_4, window_bounds = array<i64: 1, 2>}, {transform_indices = @transform_5, window_bounds = array<i64: 8, 2>}]} {
    %c0 = arith.constant 0 : index
    %c0_0 = arith.constant 0 : index
    %0 = vector.load %arg1[%c0, %c0_0] : memref<8x4xf32, #tpu.memory_space<vmem>>, vector<8x4xf32>
    %c0_1 = arith.constant 0 : index
    %c0_2 = arith.constant 0 : index
    %1 = vector.load %arg2[%c0_1, %c0_2] : memref<4x32xf32, #tpu.memory_space<vmem>>, vector<4x32xf32>
    %cst = arith.constant dense<0.000000e+00> : vector<8x32xf32>
    %2 = tpu.matmul %0, %1, %cst {dimension_numbers = #tpu.dot_dimension_numbers<[1], [0], [0], [1], [0, 0, 1, 1], [], []>} : vector<8x4xf32>, vector<4x32xf32>, vector<8x32xf32> -> vector<8x32xf32>
    %c0_3 = arith.constant 0 : index
    %c0_4 = arith.constant 0 : index
    %3 = vector.load %arg3[%c0_3, %c0_4] : memref<1x32xf32, #tpu.memory_space<vmem>>, vector<1x32xf32>
    %4 = vector.broadcast %3 : vector<1x32xf32> to vector<8x32xf32>
    %5 = arith.addf %2, %4 : vector<8x32xf32>
    %cst_5 = arith.constant 0.000000e+00 : f32
    %6 = vector.broadcast %cst_5 : f32 to vector<8x32xf32>
    %7 = arith.maximumf %5, %6 : vector<8x32xf32>
    %c0_6 = arith.constant 0 : index
    %c0_7 = arith.constant 0 : index
    %8 = vector.load %arg4[%c0_6, %c0_7] : memref<32x2xf32, #tpu.memory_space<vmem>>, vector<32x2xf32>
    %cst_8 = arith.constant dense<0.000000e+00> : vector<8x2xf32>
    %9 = tpu.matmul %7, %8, %cst_8 {dimension_numbers = #tpu.dot_dimension_numbers<[1], [0], [0], [1], [0, 0, 1, 1], [], []>} : vector<8x32xf32>, vector<32x2xf32>, vector<8x2xf32> -> vector<8x2xf32>
    %c0_9 = arith.constant 0 : index
    %c0_10 = arith.constant 0 : index
    %10 = vector.load %arg5[%c0_9, %c0_10] : memref<1x2xf32, #tpu.memory_space<vmem>>, vector<1x2xf32>
    %11 = vector.broadcast %10 : vector<1x2xf32> to vector<8x2xf32>
    %12 = arith.addf %9, %11 : vector<8x2xf32>
    %13 = vector.extract_strided_slice %12 {offsets = [0, 0], sizes = [8, 1], strides = [1, 1]} : vector<8x2xf32> to vector<8x1xf32>
    %14 = vector.extract_strided_slice %12 {offsets = [0, 1], sizes = [8, 1], strides = [1, 1]} : vector<8x2xf32> to vector<8x1xf32>
    %15 = arith.maximumf %13, %14 : vector<8x1xf32>
    %16 = arith.subf %13, %15 : vector<8x1xf32>
    %17 = math.exp %16 : vector<8x1xf32>
    %18 = arith.subf %14, %15 : vector<8x1xf32>
    %19 = math.exp %18 : vector<8x1xf32>
    %20 = arith.addf %17, %19 : vector<8x1xf32>
    %21 = tpu.reciprocal %20 {approx = true} : vector<8x1xf32> -> vector<8x1xf32>
    %22 = arith.mulf %17, %21 : vector<8x1xf32>
    %23 = arith.mulf %19, %21 : vector<8x1xf32>
    %24 = tpu.concatenate %22, %23 in 1 : vector<8x1xf32>, vector<8x1xf32> -> vector<8x2xf32>
    %c0_11 = arith.constant 0 : index
    %c0_12 = arith.constant 0 : index
    %25 = vector.load %arg6[%c0_11, %c0_12] : memref<8x2xf32, #tpu.memory_space<vmem>>, vector<8x2xf32>
    tpu.vector_store %arg6[%c0_11, %c0_12], %24 {strides = array<i32>} : memref<8x2xf32, #tpu.memory_space<vmem>>, vector<8x2xf32>,
    return
  }
  func.func @transform_0(%arg0: i32) -> (i32, i32) {
    %c0_i32 = arith.constant 0 : i32
    %c0_i32_0 = arith.constant 0 : i32
    return %arg0, %c0_i32 : i32, i32
  }
  func.func @transform_1(%arg0: i32) -> (i32, i32) {
    %c0_i32 = arith.constant 0 : i32
    %c0_i32_0 = arith.constant 0 : i32
    %c0_i32_1 = arith.constant 0 : i32
    return %c0_i32, %c0_i32_0 : i32, i32
  }
  func.func @transform_2(%arg0: i32) -> (i32, i32) {
    %c0_i32 = arith.constant 0 : i32
    %c0_i32_0 = arith.constant 0 : i32
    %c0_i32_1 = arith.constant 0 : i32
    return %c0_i32, %c0_i32_0 : i32, i32
  }
  func.func @transform_3(%arg0: i32) -> (i32, i32) {
    %c0_i32 = arith.constant 0 : i32
    %c0_i32_0 = arith.constant 0 : i32
    %c0_i32_1 = arith.constant 0 : i32
    return %c0_i32, %c0_i32_0 : i32, i32
  }
  func.func @transform_4(%arg0: i32) -> (i32, i32) {
    %c0_i32 = arith.constant 0 : i32
    %c0_i32_0 = arith.constant 0 : i32
    %c0_i32_1 = arith.constant 0 : i32
    return %c0_i32, %c0_i32_0 : i32, i32
  }
  func.func @transform_5(%arg0: i32) -> (i32, i32) {
    %c0_i32 = arith.constant 0 : i32
    %c0_i32_0 = arith.constant 0 : i32
    return %arg0, %c0_i32 : i32, i32
  }
}

</mosaic_0001>

<bundles_post_ra>
// kernel: tpu_custom_call.1
= control target key start
LH: loop header
LB: loop body
LE: loop exit
PB: predicated region body
PF: predicated region fallthrough
CT: control target
= control target key end

     0   :  { %vm33_vm0 = vcmask 1043456   ;;  %vm29_vm1 = vcmask 31744   ;;  %v266_v0 = vmov 0.0   ;;  %vm267_vm2 = vmmov 0   ;;  %s268_s7 = smov 127   ;;  %s327_s1 = inlined_call_operand.vmem [shape: f32[4,32], index: 1, kind: input, shape index: {}]   ;;  %s328_s0 = inlined_call_operand.vmem [shape: f32[8,4], index: 0, kind: input, shape index: {}]   ;;  %s329_s3 = inlined_call_operand.vmem [shape: f32[32,2], index: 3, kind: input, shape index: {}]   ;;  %s330_s2 = inlined_call_operand.vmem [shape: f32[1,32], index: 2, kind: input, shape index: {}]   ;;  %s331_s4 = inlined_call_operand.vmem [shape: f32[1,2], index: 4, kind: input, shape index: {}]   ;;  %s332_s5 = inlined_call_operand.vmem [shape: f32[8,2], index: 5, kind: output, shape index: {}]  }
   0x1   :  { %240 = vmatprep.subr.mxu0 %v266_v0  ;;  %v21_v1 = vld [vmem:[%s327_s1] sm:$0xf]  ;;  %242 = vmatprep.mubr.msk.f32.mxu0 %vm267_vm2, %v266_v0  ;;  %v111_v3 = vld [vmem:[%s329_s3 + $0x18] sm:$0xff]  ;;  %v110_v4 = vld [vmem:[%s329_s3 + $0x10] sm:$0xff]  ;;  %vm119_vm3 = vcmask 261120   ;;  %vm220_vm4 = vcmask 7168  }
   0x2   :  { %v20_v2 = vld [vmem:[%s328_s0] sm:$0xff]  ;;  %241 = vmatpush3.msk.msra.mxu0 %vm33_vm0, %v21_v1  ;;  %245 = vmatprep.subr.mxu1 %v266_v0  ;;  %v109_v5 = vld [vmem:[%s329_s3 + $0x8] sm:$0xff]  ;;  %vm222_vm5 = vcmask 15360  }
   0x3   :  { %243 = vmatmul.mubr.msk.f32.vlgmr.msra.gmra.mxu0 %vm29_vm1, %v20_v2  ;;  %246 = vmatpush3.msra.mxu1 %v111_v3  ;;  %v108_v6 = vld [vmem:[%s329_s3] sm:$0xff]  ;;  %s269_s3 = smov 1  }
   0x4   :  { %247 = vmatprep.subr.mxu1 %v266_v0  ;;  %253 = vmatprep.mubr.msk.f32.mxu1 %vm267_vm2, %v266_v0  ;;  %v228_v7 = vld [vmem:[%s330_s2] ss:$0 sm:$0xff] }
   0x5   :  { %248 = vmatpush3.msra.mxu1 %v110_v4  ;;  %v231_v12 = vld [vmem:[%s331_s4] ss:$0 sm:$0xff] }
   0x6   :  { %249 = vmatprep.subr.mxu1 %v266_v0 }
   0x7   :  { %250 = vmatpush3.msra.mxu1 %v109_v5 }
   0x8   :  { %251 = vmatprep.subr.mxu1 %v266_v0 }
   0x9   :  { %252 = vmatpush3.msra.mxu1 %v108_v6 }
  0xc3   :  { %v103_v8 = vpop.f32.mrf.mxu0 }
  0xc4   :  { %v104_v9 = vadd.f32 %v228_v7, %v103_v8 }
  0xc5   :  { %v244_v10 = vpop.f32.mrf.mxu0 }
  0xc6   :  { %v107_v11 = vmax.f32 %v104_v9, 0.0 }
  0xc8   :  { %254 = vmatmul.mubr.msk.f32.vlgmr.msra.gmra.mxu1 %vm119_vm3, %v107_v11 }
 0x188   :  { %v189_v13 = vpop.f32.mrf.mxu1 }
 0x189   :  { %v190_v14 = vadd.f32 %v231_v12, %v189_v13 }
 0x18a   :  { %v255_v15 = vpop.f32.mrf.mxu1 }
 0x18b   :  { %194 = vrot.lane.b32.xlu0 %v190_v14, %s268_s7 }
 0x1fd   :  { %v195_v16 = vpop.permute.xlu0 %194 }
 0x1fe   :  { %v197_v17 = vmax.f32 %v190_v14, %v195_v16 }
 0x200   :  { %202 = vrot.lane.b32.xlu0 %v197_v17, %s269_s3  ;;  %v198_v22 = vsub.f32 %v190_v14, %v197_v17 }
 0x202   :  { %v199_v23 = vmul.f32 1.442695, %v198_v22 }
 0x272   :  { %v203_v18 = vpop.permute.xlu0 %202 }
 0x273   :  { %v205_v19 = vsub.f32 %v190_v14, %v203_v18 }
 0x275   :  { %v206_v20 = vmul.f32 1.442695, %v205_v19 }
 0x277   :  { %260 = vpow2.f32 %v206_v20 }
 0x278   :  { %262 = vpow2.f32 %v199_v23 }
 0x284   :  { %v261_v21 = vpop.eup %260 }
 0x285   :  { %209 = vrot.lane.b32.xlu1 %v261_v21, %s268_s7  ;;  %v263_v24 = vpop.eup %262 }
 0x2f7   :  { %v210_v25 = vpop.permute.xlu1 %209 }
 0x2f8   :  { %v212_v26 = vadd.f32 %v263_v24, %v210_v25 }
 0x2fa   :  { %264 = vrcp.f32 %v212_v26 }
 0x307   :  { %v265_v27 = vpop.eup %264 }
 0x308   :  { %216 = vrot.lane.b32.xlu1 %v265_v27, %s269_s3  ;;  %v214_v28 = vmul.f32 %v265_v27, %v263_v24 }
 0x37a   :  { %v217_v29 = vpop.permute.xlu1 %216 }
 0x37b   :  { %v219_v30 = vmul.f32 %v261_v21, %v217_v29 }
 0x37d   :  { %v221_v31 = vsel %vm220_vm4, %v214_v28, %v219_v30 }
 0x37e   :  { %223 = vst.msk [vmem:[%s332_s5] sm:$0xff] %vm222_vm5, %v221_v31 }

</bundles_post_ra>
